<compile_context>
chip_gen: v7x
topology: tpu7x:2x2x1
jax: 0.10.0
libtpu: 0.0.40
codegen_flags: <defaults>
</compile_context>

<pallas_src>
import jax
import jax.numpy as jnp
from jax.experimental import pallas as pl
from jax.experimental.pallas import tpu as pltpu

_LANE = 128         # vreg lane width (hidden dim padded to this)
_TB_ALIGN = 16      # batch-tile row alignment (bf16 sublane packing)
_MAX_TB = 1024      # max batch rows per grid step (amortizes per-step overhead)
_SPLIT_BATCH = 512  # at/above this batch, force >=2 tiles (v7x megacore)


def _round_up(n, m):
    return ((n + m - 1) // m) * m


def _cdiv(a, b):
    return (a + b - 1) // b


def _mlp_kernel(x_ref, w1_ref, b1_ref, w2_ref, b2_ref, w3_ref, b3_ref, o_ref):
    # Layer 1: bf16 MXU matmul (K = logical in_dim), f32 accumulate, bias, relu.
    h1 = jnp.dot(x_ref[...], w1_ref[...],
                 preferred_element_type=jnp.float32) + b1_ref[...]
    h1 = jnp.maximum(h1, 0.0)

    # Layer 2 (lane-dense 128-K / 128-N).
    h2 = jnp.dot(h1.astype(w2_ref.dtype), w2_ref[...],
                 preferred_element_type=jnp.float32) + b2_ref[...]
    h2 = jnp.maximum(h2, 0.0)

    # Layer 3 (no activation; the torch module's softmax is unused in forward).
    y = jnp.dot(h2.astype(w3_ref.dtype), w3_ref[...],
                preferred_element_type=jnp.float32) + b3_ref[...]
    o_ref[...] = y.astype(o_ref.dtype)


def neural_net_forward(x, params):
    """Fused 3-layer MLP forward.

    x:      [batch, in_dim] float32 (logical, unpadded)
    params: dict produced by init_params
    returns [batch, out_dim] float32
    """
    batch, in_dim = x.shape
    out_dim = params["out_dim"]
    w1, b1 = params["w1"], params["b1"]
    w2, b2 = params["w2"], params["b2"]
    w3, b3 = params["w3"], params["b3"]
    hid_p = w1.shape[1]
    assert w1.shape[0] == in_dim and w3.shape[1] == out_dim

    # Near-equal, 16-aligned batch tiles.  Large batches get >=2 tiles so the
    # "parallel" axis can shard across both TensorCores on v7x.
    n_tiles = _cdiv(batch, _MAX_TB)
    if n_tiles == 1 and batch >= _SPLIT_BATCH:
        n_tiles = 2
    tb = _round_up(_cdiv(batch, n_tiles), _TB_ALIGN)
    pad_b = tb * n_tiles

    # x goes in at its logical feature width, as bf16 (the MXU operand dtype).
    # Only batch rows are padded, and only when needed.
    x_b = x.astype(jnp.bfloat16)
    if pad_b != batch:
        x_b = jnp.zeros((pad_b, in_dim), jnp.bfloat16).at[:batch, :].set(x_b)

    flops = 2 * pad_b * (in_dim * hid_p + hid_p * hid_p + hid_p * out_dim)
    bytes_accessed = (
        pad_b * in_dim * 2
        + sum(a.size * a.dtype.itemsize for a in (w1, b1, w2, b2, w3, b3))
        + pad_b * out_dim * 4)

    out = pl.pallas_call(
        _mlp_kernel,
        out_shape=jax.ShapeDtypeStruct((pad_b, out_dim), jnp.float32),
        grid_spec=pltpu.PrefetchScalarGridSpec(
            num_scalar_prefetch=0,
            grid=(n_tiles,),
            in_specs=[
                # x: one batch tile per grid step, full-extent (narrow) last dim.
                pl.BlockSpec((tb, in_dim), lambda i: (i, 0)),
                # Weights/biases: constant block index -> VMEM-resident across
                # all batch tiles (DMA'd once).
                pl.BlockSpec((in_dim, hid_p), lambda i: (0, 0)),
                pl.BlockSpec((1, hid_p), lambda i: (0, 0)),
                pl.BlockSpec((hid_p, hid_p), lambda i: (0, 0)),
                pl.BlockSpec((1, hid_p), lambda i: (0, 0)),
                pl.BlockSpec((hid_p, out_dim), lambda i: (0, 0)),
                pl.BlockSpec((1, out_dim), lambda i: (0, 0)),
            ],
            out_specs=pl.BlockSpec((tb, out_dim), lambda i: (i, 0)),
        ),
        compiler_params=pltpu.CompilerParams(
            dimension_semantics=("parallel",)),
        cost_estimate=pl.CostEstimate(
            flops=flops, transcendentals=0, bytes_accessed=bytes_accessed),
    )(x_b, w1, b1, w2, b2, w3, b3)

    # Only batch-row padding (if any) needs slicing; output width is logical.
    if pad_b != batch:
        out = out[:batch, :]
    return out


def init_params(key, in_dim, out_dim, n_hid):
    """torch.nn.Linear-style init (U(-1/sqrt(fan_in), +bound)).

    Weights are stored pre-transposed as [fan_in, fan_out] in bf16.  Only the
    hidden dimension is zero-padded to the lane width (128); the input and
    output feature dims stay at their logical sizes.  Biases stay f32.
    """
    ks = jax.random.split(key, 6)
    hid_p = _round_up(n_hid, _LANE)

    def linear(kw, kb, fan_in, fan_out, fan_in_p, fan_out_p):
        bound = 1.0 / jnp.sqrt(fan_in)
        w = jax.random.uniform(kw, (fan_in, fan_out), jnp.float32, -bound, bound)
        b = jax.random.uniform(kb, (fan_out,), jnp.float32, -bound, bound)
        w_p = jnp.zeros((fan_in_p, fan_out_p), jnp.float32).at[:fan_in, :fan_out].set(w)
        b_p = jnp.zeros((1, fan_out_p), jnp.float32).at[0, :fan_out].set(b)
        return w_p.astype(jnp.bfloat16), b_p

    w1, b1 = linear(ks[0], ks[1], in_dim, n_hid, in_dim, hid_p)
    w2, b2 = linear(ks[2], ks[3], n_hid, n_hid, hid_p, hid_p)
    w3, b3 = linear(ks[4], ks[5], n_hid, out_dim, hid_p, out_dim)
    return {"w1": w1, "b1": b1, "w2": w2, "b2": b2, "w3": w3, "b3": b3,
            "in_dim": in_dim, "out_dim": out_dim, "n_hid": n_hid}


def _reference(x, params):
    """Pure-JAX reference using the exact same bf16 weights / f32 accumulate."""
    h1 = jnp.maximum(
        jnp.dot(x.astype(jnp.bfloat16), params["w1"],
                preferred_element_type=jnp.float32) + params["b1"], 0.0)
    h2 = jnp.maximum(
        jnp.dot(h1.astype(jnp.bfloat16), params["w2"],
                preferred_element_type=jnp.float32) + params["b2"], 0.0)
    y = jnp.dot(h2.astype(jnp.bfloat16), params["w3"],
                preferred_element_type=jnp.float32) + params["b3"]
    return y


if __name__ == "__main__":
    key = jax.random.PRNGKey(0)
    in_dim, out_dim, n_hid = 16, 8, 32

    kx, kp, kx2, kx3 = jax.random.split(key, 4)
    params = init_params(kp, in_dim, out_dim, n_hid)

    # Small batch (single grid step, batch rows padded 8 -> 16).
    batch = 8
    x = jax.random.normal(kx, (batch, in_dim), jnp.float32)
    y = jax.block_until_ready(neural_net_forward(x, params))
    y_ref = _reference(x, params)
    assert y.shape == (batch, out_dim)
    assert jnp.allclose(y, y_ref, atol=1e-2, rtol=1e-2)

    # Ragged batch: near-exact 16-aligned padding (200 -> 208 rows).
    batch2 = 200
    x2 = jax.random.normal(kx2, (batch2, in_dim), jnp.float32)
    y2 = jax.block_until_ready(neural_net_forward(x2, params))
    y2_ref = _reference(x2, params)
    assert y2.shape == (batch2, out_dim)
    assert jnp.allclose(y2, y2_ref, atol=1e-2, rtol=1e-2)

    # Larger batch: >=2 balanced tiles (megacore path), zero row padding.
    batch3 = 1536
    x3 = jax.random.normal(kx3, (batch3, in_dim), jnp.float32)
    y3 = jax.block_until_ready(neural_net_forward(x3, params))
    y3_ref = _reference(x3, params)
    assert y3.shape == (batch3, out_dim)
    assert jnp.allclose(y3, y3_ref, atol=1e-2, rtol=1e-2)

    print("KERNEL_OK")
</pallas_src>

<mosaic_0001>
module attributes {stable_mosaic.version = 11 : i64} {
  func.func @_mlp_kernel(%arg0: i32, %arg1: memref<16x16xbf16, #tpu.memory_space<vmem>>, %arg2: memref<16x128xbf16, #tpu.memory_space<vmem>>, %arg3: memref<1x128xf32, #tpu.memory_space<vmem>>, %arg4: memref<128x128xbf16, #tpu.memory_space<vmem>>, %arg5: memref<1x128xf32, #tpu.memory_space<vmem>>, %arg6: memref<128x8xbf16, #tpu.memory_space<vmem>>, %arg7: memref<1x8xf32, #tpu.memory_space<vmem>>, %arg8: memref<16x8xf32, #tpu.memory_space<vmem>>) attributes {dimension_semantics = [#tpu.dimension_semantics<parallel>], iteration_bounds = array<i64: 1>, scalar_prefetch = 0 : i64, scratch_operands = 0 : i64, tpu.core_type = #tpu.core_type<tc>, window_params = [{transform_indices = @transform_0, window_bounds = array<i64: 16, 16>}, {pipeline_mode = #tpu.pipeline_mode<synchronous>, transform_indices = @transform_1, window_bounds = array<i64: 16, 128>}, {pipeline_mode = #tpu.pipeline_mode<synchronous>, transform_indices = @transform_2, window_bounds = array<i64: 1, 128>}, {pipeline_mode = #tpu.pipeline_mode<synchronous>, transform_indices = @transform_3, window_bounds = array<i64: 128, 128>}, {pipeline_mode = #tpu.pipeline_mode<synchronous>, transform_indices = @transform_4, window_bounds = array<i64: 1, 128>}, {pipeline_mode = #tpu.pipeline_mode<synchronous>, transform_indices = @transform_5, window_bounds = array<i64: 128, 8>}, {pipeline_mode = #tpu.pipeline_mode<synchronous>, transform_indices = @transform_6, window_bounds = array<i64: 1, 8>}, {transform_indices = @transform_7, window_bounds = array<i64: 16, 8>}]} {
    %c0 = arith.constant 0 : index
    %c0_0 = arith.constant 0 : index
    %0 = vector.load %arg1[%c0, %c0_0] : memref<16x16xbf16, #tpu.memory_space<vmem>>, vector<16x16xbf16>
    %c0_1 = arith.constant 0 : index
    %c0_2 = arith.constant 0 : index
    %1 = vector.load %arg2[%c0_1, %c0_2] : memref<16x128xbf16, #tpu.memory_space<vmem>>, vector<16x128xbf16>
    %cst = arith.constant dense<0.000000e+00> : vector<16x128xf32>
    %2 = tpu.matmul %0, %1, %cst {dimension_numbers = #tpu.dot_dimension_numbers<[1], [0], [0], [1], [0, 0, 1, 1], [], []>} : vector<16x16xbf16>, vector<16x128xbf16>, vector<16x128xf32> -> vector<16x128xf32>
    %c0_3 = arith.constant 0 : index
    %c0_4 = arith.constant 0 : index
    %3 = vector.load %arg3[%c0_3, %c0_4] : memref<1x128xf32, #tpu.memory_space<vmem>>, vector<1x128xf32>
    %4 = vector.broadcast %3 : vector<1x128xf32> to vector<16x128xf32>
    %5 = arith.addf %2, %4 : vector<16x128xf32>
    %cst_5 = arith.constant 0.000000e+00 : f32
    %6 = vector.broadcast %cst_5 : f32 to vector<16x128xf32>
    %7 = arith.maximumf %5, %6 : vector<16x128xf32>
    %8 = arith.truncf %7 : vector<16x128xf32> to vector<16x128xbf16>
    %c0_6 = arith.constant 0 : index
    %c0_7 = arith.constant 0 : index
    %9 = vector.load %arg4[%c0_6, %c0_7] : memref<128x128xbf16, #tpu.memory_space<vmem>>, vector<128x128xbf16>
    %cst_8 = arith.constant dense<0.000000e+00> : vector<16x128xf32>
    %10 = tpu.matmul %8, %9, %cst_8 {dimension_numbers = #tpu.dot_dimension_numbers<[1], [0], [0], [1], [0, 0, 1, 1], [], []>} : vector<16x128xbf16>, vector<128x128xbf16>, vector<16x128xf32> -> vector<16x128xf32>
    %c0_9 = arith.constant 0 : index
    %c0_10 = arith.constant 0 : index
    %11 = vector.load %arg5[%c0_9, %c0_10] : memref<1x128xf32, #tpu.memory_space<vmem>>, vector<1x128xf32>
    %12 = vector.broadcast %11 : vector<1x128xf32> to vector<16x128xf32>
    %13 = arith.addf %10, %12 : vector<16x128xf32>
    %cst_11 = arith.constant 0.000000e+00 : f32
    %14 = vector.broadcast %cst_11 : f32 to vector<16x128xf32>
    %15 = arith.maximumf %13, %14 : vector<16x128xf32>
    %16 = arith.truncf %15 : vector<16x128xf32> to vector<16x128xbf16>
    %c0_12 = arith.constant 0 : index
    %c0_13 = arith.constant 0 : index
    %17 = vector.load %arg6[%c0_12, %c0_13] : memref<128x8xbf16, #tpu.memory_space<vmem>>, vector<128x8xbf16>
    %cst_14 = arith.constant dense<0.000000e+00> : vector<16x8xf32>
    %18 = tpu.matmul %16, %17, %cst_14 {dimension_numbers = #tpu.dot_dimension_numbers<[1], [0], [0], [1], [0, 0, 1, 1], [], []>} : vector<16x128xbf16>, vector<128x8xbf16>, vector<16x8xf32> -> vector<16x8xf32>
    %c0_15 = arith.constant 0 : index
    %c0_16 = arith.constant 0 : index
    %19 = vector.load %arg7[%c0_15, %c0_16] : memref<1x8xf32, #tpu.memory_space<vmem>>, vector<1x8xf32>
    %20 = vector.broadcast %19 : vector<1x8xf32> to vector<16x8xf32>
    %21 = arith.addf %18, %20 : vector<16x8xf32>
    %c0_17 = arith.constant 0 : index
    %c0_18 = arith.constant 0 : index
    %22 = vector.load %arg8[%c0_17, %c0_18] : memref<16x8xf32, #tpu.memory_space<vmem>>, vector<16x8xf32>
    tpu.vector_store %arg8[%c0_17, %c0_18], %21 {strides = array<i32>} : memref<16x8xf32, #tpu.memory_space<vmem>>, vector<16x8xf32>,
    return
  }
  func.func @transform_0(%arg0: i32) -> (i32, i32) {
    %c0_i32 = arith.constant 0 : i32
    %c0_i32_0 = arith.constant 0 : i32
    return %arg0, %c0_i32 : i32, i32
  }
  func.func @transform_1(%arg0: i32) -> (i32, i32) {
    %c0_i32 = arith.constant 0 : i32
    %c0_i32_0 = arith.constant 0 : i32
    %c0_i32_1 = arith.constant 0 : i32
    return %c0_i32, %c0_i32_0 : i32, i32
  }
  func.func @transform_2(%arg0: i32) -> (i32, i32) {
    %c0_i32 = arith.constant 0 : i32
    %c0_i32_0 = arith.constant 0 : i32
    %c0_i32_1 = arith.constant 0 : i32
    return %c0_i32, %c0_i32_0 : i32, i32
  }
  func.func @transform_3(%arg0: i32) -> (i32, i32) {
    %c0_i32 = arith.constant 0 : i32
    %c0_i32_0 = arith.constant 0 : i32
    %c0_i32_1 = arith.constant 0 : i32
    return %c0_i32, %c0_i32_0 : i32, i32
  }
  func.func @transform_4(%arg0: i32) -> (i32, i32) {
    %c0_i32 = arith.constant 0 : i32
    %c0_i32_0 = arith.constant 0 : i32
    %c0_i32_1 = arith.constant 0 : i32
    return %c0_i32, %c0_i32_0 : i32, i32
  }
  func.func @transform_5(%arg0: i32) -> (i32, i32) {
    %c0_i32 = arith.constant 0 : i32
    %c0_i32_0 = arith.constant 0 : i32
    %c0_i32_1 = arith.constant 0 : i32
    return %c0_i32, %c0_i32_0 : i32, i32
  }
  func.func @transform_6(%arg0: i32) -> (i32, i32) {
    %c0_i32 = arith.constant 0 : i32
    %c0_i32_0 = arith.constant 0 : i32
    %c0_i32_1 = arith.constant 0 : i32
    return %c0_i32, %c0_i32_0 : i32, i32
  }
  func.func @transform_7(%arg0: i32) -> (i32, i32) {
    %c0_i32 = arith.constant 0 : i32
    %c0_i32_0 = arith.constant 0 : i32
    return %arg0, %c0_i32 : i32, i32
  }
}

</mosaic_0001>

<bundles_post_ra>
// kernel: tpu_custom_call.1
= control target key start
LH: loop header
LB: loop body
LE: loop exit
PB: predicated region body
PF: predicated region fallthrough
CT: control target
= control target key end

     0   :  { %12 = vsyncpa [#allocation3], 0  ;;  %s481_s24 = smov [#allocation2]   ;;  %s624_s0 = inlined_call_operand.vmem [shape: bf16[16,16], index: 0, kind: input, shape index: {}]   ;;  %s625_s1 = inlined_call_operand.hbm [shape: bf16[16,128], index: 1, kind: input, shape index: {}]   ;;  %s626_s2 = inlined_call_operand.vmem [shape: f32[1,128], index: 2, kind: input, shape index: {}]   ;;  %s627_s3 = inlined_call_operand.vmem [shape: bf16[128,128], index: 3, kind: input, shape index: {}]   ;;  %s628_s4 = inlined_call_operand.vmem [shape: f32[1,128], index: 4, kind: input, shape index: {}]   ;;  %s629_s5 = inlined_call_operand.vmem [shape: bf16[128,8], index: 5, kind: input, shape index: {}]   ;;  %s630_s6 = inlined_call_operand.vmem [shape: f32[1,8], index: 6, kind: input, shape index: {}]   ;;  %s631_s7 = inlined_call_operand.vmem [shape: f32[16,8], index: 7, kind: output, shape index: {}]  }
   0x1   :  { %s20_s25 = sshll.u32 %s481_s24, 4  ;;  %s457_s28 = scalar_lea.hbm %s625_s1, 128  ;;  %s21_s25 = int_to_ptr.vmem [resolvable:$true] %s20_s25 }
   0x2   :  { %p458_p0 = scmp.ne.s32.totalorder %s625_s1, %s457_s28  ;;  %p461_p1 = scmp.lt.u32.totalorder %s457_s28, %s625_s1 }
   0x4   :  { %p463_p2 = pnand %p461_p1, %p458_p0 }
   0x6   :  { %466 = shalt.err (!%p463_p2)
}
   0x7   :  { %s467_s10 = scalar_lea.vmem %s21_s25, 128  ;;  %p472_p4 = scmp.lt.s32.totalorder %s21_s25, %s21_s25 }
   0x8   :  { %p468_p3 = scmp.ne.s32.totalorder %s21_s25, %s467_s10  ;;  %p473_p5 = scmp.lt.s32.totalorder %s467_s10, %s467_s10 }
   0xa   :  { %p474_p6 = por %p473_p5, %p472_p4 }
   0xc   :  { %p475_p7 = pnand %p474_p6, %p468_p3 }
   0xe   :  { %478 = shalt.err (!%p475_p7)
}
   0xf   :  { %s482_s11 = smov 64   ;;  %s483_s12 = smov 4  }
  0x10   :  { %26 = dma.hbm_to_vmem [thread:$0]  %s625_s1, 128, %s21_s25, [#allocation3], %s482_s11, %s482_s11, %s483_s12  }
  0x11   :  { %479 = dma.done.wait [#allocation3], 128  }
  0x12   :  { %480 = vsyncadd [#allocation3], 4294967168  ;;  %v484_v0 = vmov 0.0   ;;  %vm485_vm0 = vmmov 0   ;;  %v439_v1 = vld [vmem:[#allocation2] sm:$0xff]   ;;  %vm63_vm1 = vcmask 130048  }
  0x13   :  { %388 = vmatprep.subr.bf16.mxu0 %v484_v0  ;;  %390 = vmatprep.mubr.msk.bf16.mxu0 %vm485_vm0, %v484_v0  ;;  %v440_v2 = vld [vmem:[%s624_s0] sm:$0xff]   ;;  %v442_v4 = vld [vmem:[%s627_s3 + $0x8] sm:$0xff]   ;;  %v443_v5 = vld [vmem:[%s627_s3 + $0x10] sm:$0xff]   ;;  %vm338_vm2 = vcmask 64512  }
  0x14   :  { %394 = vmatprep.subr.bf16.mxu1 %v484_v0  ;;  %410 = vmatprep.mubr.msk.bf16.mxu1 %vm485_vm0, %v484_v0  ;;  %v441_v3 = vld [vmem:[%s627_s3] sm:$0xff]   ;;  %v444_v6 = vld [vmem:[%s627_s3 + $0x18] sm:$0xff]   ;;  %v446_v8 = vld [vmem:[%s627_s3 + $0x28] sm:$0xff]  }
  0x15   :  { %389 = vmatpush3.bf16.msra.mxu0 %v439_v1  ;;  %395 = vmatpush3.bf16.msra.mxu1 %v441_v3  ;;  %v445_v7 = vld [vmem:[%s627_s3 + $0x20] sm:$0xff]   ;;  %v447_v9 = vld [vmem:[%s627_s3 + $0x30] sm:$0xff]   ;;  %v448_v10 = vld [vmem:[%s627_s3 + $0x38] sm:$0xff]  }
  0x16   :  { %414 = vmatprep.subr.bf16.mxu0 %v484_v0  ;;  %396 = vmatprep.subr.bf16.mxu1 %v484_v0  ;;  %v449_v11 = vld [vmem:[%s629_s5] sm:$0xff]   ;;  %v450_v12 = vld [vmem:[%s629_s5 + $0x8] sm:$0xff]   ;;  %v451_v13 = vld [vmem:[%s629_s5 + $0x10] sm:$0xff]  }
  0x17   :  { %v452_v14 = vld [vmem:[%s629_s5 + $0x18] sm:$0xff]   ;;  %v453_v15 = vld [vmem:[%s629_s5 + $0x20] sm:$0xff]   ;;  %v454_v16 = vld [vmem:[%s629_s5 + $0x28] sm:$0xff]  }
  0x18   :  { %391 = vmatmul.mubr.msk.bf16.vlgmr.msra.gmra.mrb[0].mxu0 %vm63_vm1, %v440_v2  ;;  %v346_v17 = vld [vmem:[%s626_s2] ss:$0 sm:$0xff]  ;;  %v455_v27 = vld [vmem:[%s629_s5 + $0x30] sm:$0xff]   ;;  %v456_v28 = vld [vmem:[%s629_s5 + $0x38] sm:$0xff]  }
  0x19   :  { %430 = vmatprep.mubr.msk.bf16.mxu0 %vm485_vm0, %v484_v0  ;;  %397 = vmatpush3.bf16.msra.mxu1 %v442_v4  ;;  %v350_v29 = vld [vmem:[%s628_s4] ss:$0 sm:$0xff] }
  0x1a   :  { %398 = vmatprep.subr.bf16.mxu1 %v484_v0  ;;  %415 = vmatpush3.bf16.msra.mxu0 %v449_v11  ;;  %v359_v39 = vld [vmem:[%s630_s6] ss:$0 sm:$0xff] }
  0x1b   :  { %416 = vmatprep.subr.bf16.mxu0 %v484_v0 }
  0x1d   :  { %399 = vmatpush3.bf16.msra.mxu1 %v443_v5 }
  0x1e   :  { %400 = vmatprep.subr.bf16.mxu1 %v484_v0  ;;  %417 = vmatpush3.bf16.msra.mxu0 %v450_v12 }
  0x1f   :  { %418 = vmatprep.subr.bf16.mxu0 %v484_v0 }
  0x21   :  { %401 = vmatpush3.bf16.msra.mxu1 %v444_v6 }
  0x22   :  { %402 = vmatprep.subr.bf16.mxu1 %v484_v0  ;;  %419 = vmatpush3.bf16.msra.mxu0 %v451_v13 }
  0x23   :  { %420 = vmatprep.subr.bf16.mxu0 %v484_v0 }
  0x25   :  { %403 = vmatpush3.bf16.msra.mxu1 %v445_v7 }
  0x26   :  { %404 = vmatprep.subr.bf16.mxu1 %v484_v0  ;;  %421 = vmatpush3.bf16.msra.mxu0 %v452_v14 }
  0x27   :  { %422 = vmatprep.subr.bf16.mxu0 %v484_v0 }
  0x29   :  { %405 = vmatpush3.bf16.msra.mxu1 %v446_v8 }
  0x2a   :  { %406 = vmatprep.subr.bf16.mxu1 %v484_v0  ;;  %423 = vmatpush3.bf16.msra.mxu0 %v453_v15 }
  0x2b   :  { %424 = vmatprep.subr.bf16.mxu0 %v484_v0 }
  0x2d   :  { %407 = vmatpush3.bf16.msra.mxu1 %v447_v9 }
  0x2e   :  { %408 = vmatprep.subr.bf16.mxu1 %v484_v0  ;;  %425 = vmatpush3.bf16.msra.mxu0 %v454_v16 }
  0x2f   :  { %426 = vmatprep.subr.bf16.mxu0 %v484_v0 }
  0x31   :  { %409 = vmatpush3.bf16.msra.mxu1 %v448_v10 }
  0x32   :  { %427 = vmatpush3.bf16.msra.mxu0 %v455_v27 }
  0x33   :  { %428 = vmatprep.subr.bf16.mxu0 %v484_v0 }
  0x36   :  { %429 = vmatpush3.bf16.msra.mxu0 %v456_v28 }
  0xeb   :  { %v101_v18 = vpop.f32.mrb[0].mxu0 }
  0xec   :  { %v102_v19 = vadd.f32 %v346_v17, %v101_v18  ;;  %v392_v20 = vpop.f32.mrb[1].mxu0 }
  0xed   :  { %v104_v21 = vpop.f32.mrb[2].mxu0 }
  0xee   :  { %v105_v22 = vadd.f32 %v346_v17, %v104_v21  ;;  %v393_v23 = vpop.f32.mrb[3].mxu0  ;;  %v108_v24 = vmax.f32 %v102_v19, 0.0 }
  0xf0   :  { %v109_v25 = vmax.f32 %v105_v22, 0.0 }
  0xf2   :  { %v110_v26 = vpack.c.bf16 %v109_v25, %v108_v24 }
  0xf4   :  { %411 = vmatmul.mubr.bf16.vlgmr.msra.gmra.mrb[0].mxu1 %v110_v26 }
 0x1c7   :  { %v216_v30 = vpop.f32.mrb[0].mxu1 }
 0x1c8   :  { %v217_v31 = vadd.f32 %v350_v29, %v216_v30  ;;  %v412_v32 = vpop.f32.mrb[1].mxu1 }
 0x1c9   :  { %v219_v33 = vpop.f32.mrb[2].mxu1 }
 0x1ca   :  { %v220_v34 = vadd.f32 %v350_v29, %v219_v33  ;;  %v413_v35 = vpop.f32.mrb[3].mxu1  ;;  %v223_v36 = vmax.f32 %v217_v31, 0.0 }
 0x1cc   :  { %v224_v37 = vmax.f32 %v220_v34, 0.0 }
 0x1ce   :  { %v225_v38 = vpack.c.bf16 %v224_v37, %v223_v36 }
 0x1d0   :  { %431 = vmatmul.mubr.bf16.vlgmr.msra.gmra.mrb[4].mxu0 %v225_v38 }
 0x2a3   :  { %v331_v40 = vpop.f32.mrb[4].mxu0 }
 0x2a4   :  { %v332_v41 = vadd.f32 %v359_v39, %v331_v40  ;;  %v432_v42 = vpop.f32.mrb[5].mxu0 }
 0x2a5   :  { %v334_v43 = vpop.f32.mrb[6].mxu0 }
 0x2a6   :  { %339 = vst.msk [vmem:[%s631_s7] sm:$0xff] %vm338_vm2, %v332_v41  ;;  %v335_v44 = vadd.f32 %v359_v39, %v334_v43  ;;  %v433_v45 = vpop.f32.mrb[7].mxu0 }
 0x2a8   :  { %340 = vst.msk [vmem:[%s631_s7 + $0x8] sm:$0xff] %vm338_vm2, %v335_v44 }
 0x2a9   :  { %345 = vsyncpa [#allocation3], 1 }

</bundles_post_ra>
